<compile_context>
chip_gen: v7x
topology: tpu7x:2x2x1
jax: 0.10.0
libtpu: 0.0.40
codegen_flags: <defaults>
</compile_context>

<pallas_src>
from functools import partial

import jax
import jax.numpy as jnp
from jax.experimental import pallas as pl
from jax.experimental.pallas import tpu as pltpu

_SUB = 8  # f32 sublane granularity


def _round_up(n, m):
    return ((n + m - 1) // m) * m


def policy_kernel(x_ref, w1_ref, b1_ref, w2_ref, b2_ref, out_ref):
    # Hidden layer: x @ W1 + b1, ReLU.  If weights are bf16, cast x in VMEM
    # (no extra HBM pass) so the MXU runs a single-pass bf16 matmul; always
    # accumulate in f32.
    x = x_ref[...].astype(w1_ref.dtype)
    h = jnp.dot(x, w1_ref[...], preferred_element_type=jnp.float32) + b1_ref[...]
    h = jnp.maximum(h, 0.0)

    # Output layer: h @ W2 + b2 -> (tile_b, A) logits on the real action lanes.
    logits = (
        jnp.dot(h.astype(w2_ref.dtype), w2_ref[...],
                preferred_element_type=jnp.float32)
        + b2_ref[...]
    )

    # Numerically stable, exact softmax over the true action dim.
    m = jnp.max(logits, axis=-1, keepdims=True)
    e = jnp.exp(logits - m)
    s = jnp.sum(e, axis=-1, keepdims=True)
    out_ref[...] = (e / s).astype(out_ref.dtype)


def prepare_params(w1, b1, w2, b2, *, weights_dtype=jnp.float32):
    """One-time weight prep (hoisted out of the per-step RL call path).

    w1: (state_dim, hidden_dim)   -- input-major, i.e. PyTorch W1.T
    b1: (hidden_dim,)
    w2: (hidden_dim, action_dim)  -- input-major, i.e. PyTorch W2.T
    b2: (action_dim,)
    weights_dtype: jnp.float32 or jnp.bfloat16 (halves resident-weight DMA;
                   biases / accumulation / softmax stay f32).
    """
    w1 = jnp.asarray(w1, weights_dtype)
    w2 = jnp.asarray(w2, weights_dtype)
    b1 = jnp.asarray(b1, jnp.float32).reshape(1, -1)
    b2 = jnp.asarray(b2, jnp.float32).reshape(1, -1)
    return (w1, b1, w2, b2)


@partial(jax.jit, static_argnames=("tile_b_cap",))
def policy_network(x, params, tile_b_cap=4096):
    """probs = softmax(relu(x @ W1 + b1) @ W2 + b2, axis=-1)

    x: (B, state_dim) f32, params from prepare_params().
    Returns (B, action_dim) f32 probabilities.
    """
    w1, b1, w2, b2 = params
    x = jnp.asarray(x, jnp.float32)

    B, K = x.shape
    H = w1.shape[1]
    A = w2.shape[1]

    # Batch tile: multiple of 8 (sublane), >= 2 grid steps when possible so
    # both v7x TensorCores get work, capped to amortize per-step overhead.
    tile_b = max(_SUB, min(tile_b_cap, _round_up(pl.cdiv(B, 2), _SUB)))
    grid_b = pl.cdiv(B, tile_b)
    B_p = grid_b * tile_b
    if B_p != B:
        x = jnp.pad(x, ((0, B_p - B), (0, 0)))  # batch rows only; features unpadded

    w_itemsize = jnp.dtype(w1.dtype).itemsize
    cost = pl.CostEstimate(
        flops=2 * B_p * (K * H + H * A),
        transcendentals=B_p * A,
        bytes_accessed=(
            B_p * K * 4                       # x in
            + (K * H + H * A) * w_itemsize    # weights (resident)
            + (H + A) * 4                     # biases
            + B_p * A * 4                     # out
        ),
    )

    out = pl.pallas_call(
        policy_kernel,
        out_shape=jax.ShapeDtypeStruct((B_p, A), jnp.float32),
        grid_spec=pltpu.PrefetchScalarGridSpec(
            num_scalar_prefetch=0,
            grid=(grid_b,),
            in_specs=[
                pl.BlockSpec((tile_b, K), lambda i: (i, 0)),  # x: tiled over batch
                pl.BlockSpec((K, H), lambda i: (0, 0)),       # w1: VMEM-resident
                pl.BlockSpec((1, H), lambda i: (0, 0)),       # b1: resident
                pl.BlockSpec((H, A), lambda i: (0, 0)),       # w2: resident
                pl.BlockSpec((1, A), lambda i: (0, 0)),       # b2: resident
            ],
            out_specs=pl.BlockSpec((tile_b, A), lambda i: (i, 0)),
        ),
        compiler_params=pltpu.CompilerParams(
            dimension_semantics=("parallel",),
        ),
        cost_estimate=cost,
    )(x, w1, b1, w2, b2)

    if B_p != B:
        out = out[:B]
    return out


def init_params(key, state_dim, action_dim, hidden_dim):
    # Deterministic init mimicking nn.Linear's uniform(-1/sqrt(fan_in), +1/sqrt(fan_in))
    k1, k2, k3, k4 = jax.random.split(key, 4)
    lim1 = 1.0 / jnp.sqrt(jnp.float32(state_dim))
    lim2 = 1.0 / jnp.sqrt(jnp.float32(hidden_dim))
    w1 = jax.random.uniform(k1, (state_dim, hidden_dim), jnp.float32, -lim1, lim1)
    b1 = jax.random.uniform(k2, (hidden_dim,), jnp.float32, -lim1, lim1)
    w2 = jax.random.uniform(k3, (hidden_dim, action_dim), jnp.float32, -lim2, lim2)
    b2 = jax.random.uniform(k4, (action_dim,), jnp.float32, -lim2, lim2)
    return w1, b1, w2, b2


if __name__ == "__main__":
    batch = 8
    state_dim = 16
    action_dim = 4
    hidden_dim = 32

    key = jax.random.PRNGKey(0)
    kx, kp = jax.random.split(key)
    x = jax.random.normal(kx, (batch, state_dim), jnp.float32)
    w1, b1, w2, b2 = init_params(kp, state_dim, action_dim, hidden_dim)

    # Reference in plain JAX (f32).
    h_ref = jnp.maximum(x @ w1 + b1[None, :], 0.0)
    probs_ref = jax.nn.softmax(h_ref @ w2 + b2[None, :], axis=-1)

    # f32 weight path (exact).
    params_f32 = prepare_params(w1, b1, w2, b2)
    out = jax.block_until_ready(policy_network(x, params_f32))
    assert out.shape == (batch, action_dim)
    assert jnp.allclose(out, probs_ref, atol=1e-4, rtol=1e-4)
    assert jnp.allclose(jnp.sum(out, axis=-1), 1.0, atol=1e-5)

    # bf16-weight path (halved weight DMA), looser tolerance.
    params_bf16 = prepare_params(w1, b1, w2, b2, weights_dtype=jnp.bfloat16)
    out_bf16 = jax.block_until_ready(policy_network(x, params_bf16))
    assert out_bf16.shape == (batch, action_dim)
    assert jnp.allclose(out_bf16, probs_ref, atol=2e-2, rtol=2e-2)
    assert jnp.allclose(jnp.sum(out_bf16, axis=-1), 1.0, atol=1e-3)

    print("KERNEL_OK")
</pallas_src>

<mosaic_0001>
module attributes {stable_mosaic.version = 11 : i64} {
  func.func @policy_kernel(%arg0: i32, %arg1: memref<8x16xf32, #tpu.memory_space<vmem>>, %arg2: memref<16x32xf32, #tpu.memory_space<vmem>>, %arg3: memref<1x32xf32, #tpu.memory_space<vmem>>, %arg4: memref<32x4xf32, #tpu.memory_space<vmem>>, %arg5: memref<1x4xf32, #tpu.memory_space<vmem>>, %arg6: memref<8x4xf32, #tpu.memory_space<vmem>>) attributes {dimension_semantics = [#tpu.dimension_semantics<parallel>], iteration_bounds = array<i64: 1>, scalar_prefetch = 0 : i64, scratch_operands = 0 : i64, tpu.core_type = #tpu.core_type<tc>, window_params = [{transform_indices = @transform_0, window_bounds = array<i64: 8, 16>}, {pipeline_mode = #tpu.pipeline_mode<synchronous>, transform_indices = @transform_1, window_bounds = array<i64: 16, 32>}, {pipeline_mode = #tpu.pipeline_mode<synchronous>, transform_indices = @transform_2, window_bounds = array<i64: 1, 32>}, {pipeline_mode = #tpu.pipeline_mode<synchronous>, transform_indices = @transform_3, window_bounds = array<i64: 32, 4>}, {pipeline_mode = #tpu.pipeline_mode<synchronous>, transform_indices = @transform_4, window_bounds = array<i64: 1, 4>}, {transform_indices = @transform_5, window_bounds = array<i64: 8, 4>}]} {
    %c0 = arith.constant 0 : index
    %c0_0 = arith.constant 0 : index
    %0 = vector.load %arg1[%c0, %c0_0] : memref<8x16xf32, #tpu.memory_space<vmem>>, vector<8x16xf32>
    %c0_1 = arith.constant 0 : index
    %c0_2 = arith.constant 0 : index
    %1 = vector.load %arg2[%c0_1, %c0_2] : memref<16x32xf32, #tpu.memory_space<vmem>>, vector<16x32xf32>
    %cst = arith.constant dense<0.000000e+00> : vector<8x32xf32>
    %2 = tpu.matmul %0, %1, %cst {dimension_numbers = #tpu.dot_dimension_numbers<[1], [0], [0], [1], [0, 0, 1, 1], [], []>} : vector<8x16xf32>, vector<16x32xf32>, vector<8x32xf32> -> vector<8x32xf32>
    %c0_3 = arith.constant 0 : index
    %c0_4 = arith.constant 0 : index
    %3 = vector.load %arg3[%c0_3, %c0_4] : memref<1x32xf32, #tpu.memory_space<vmem>>, vector<1x32xf32>
    %4 = vector.broadcast %3 : vector<1x32xf32> to vector<8x32xf32>
    %5 = arith.addf %2, %4 : vector<8x32xf32>
    %cst_5 = arith.constant 0.000000e+00 : f32
    %6 = vector.broadcast %cst_5 : f32 to vector<8x32xf32>
    %7 = arith.maximumf %5, %6 : vector<8x32xf32>
    %c0_6 = arith.constant 0 : index
    %c0_7 = arith.constant 0 : index
    %8 = vector.load %arg4[%c0_6, %c0_7] : memref<32x4xf32, #tpu.memory_space<vmem>>, vector<32x4xf32>
    %cst_8 = arith.constant dense<0.000000e+00> : vector<8x4xf32>
    %9 = tpu.matmul %7, %8, %cst_8 {dimension_numbers = #tpu.dot_dimension_numbers<[1], [0], [0], [1], [0, 0, 1, 1], [], []>} : vector<8x32xf32>, vector<32x4xf32>, vector<8x4xf32> -> vector<8x4xf32>
    %c0_9 = arith.constant 0 : index
    %c0_10 = arith.constant 0 : index
    %10 = vector.load %arg5[%c0_9, %c0_10] : memref<1x4xf32, #tpu.memory_space<vmem>>, vector<1x4xf32>
    %11 = vector.broadcast %10 : vector<1x4xf32> to vector<8x4xf32>
    %12 = arith.addf %9, %11 : vector<8x4xf32>
    %cst_11 = arith.constant dense<0xFF800000> : vector<8xf32>
    %13 = vector.multi_reduction <maximumf>, %12, %cst_11 [1] : vector<8x4xf32> to vector<8xf32>
    %14 = vector.shape_cast %13 : vector<8xf32> to vector<8x1xf32>
    %15 = vector.broadcast %14 : vector<8x1xf32> to vector<8x4xf32>
    %16 = arith.subf %12, %15 : vector<8x4xf32>
    %17 = math.exp %16 : vector<8x4xf32>
    %cst_12 = arith.constant dense<0.000000e+00> : vector<8xf32>
    %18 = vector.multi_reduction <add>, %17, %cst_12 [1] : vector<8x4xf32> to vector<8xf32>
    %19 = vector.shape_cast %18 : vector<8xf32> to vector<8x1xf32>
    %20 = vector.broadcast %19 : vector<8x1xf32> to vector<8x4xf32>
    %21 = arith.divf %17, %20 : vector<8x4xf32>
    %c0_13 = arith.constant 0 : index
    %c0_14 = arith.constant 0 : index
    %22 = vector.load %arg6[%c0_13, %c0_14] : memref<8x4xf32, #tpu.memory_space<vmem>>, vector<8x4xf32>
    tpu.vector_store %arg6[%c0_13, %c0_14], %21 {strides = array<i32>} : memref<8x4xf32, #tpu.memory_space<vmem>>, vector<8x4xf32>,
    return
  }
  func.func @transform_0(%arg0: i32) -> (i32, i32) {
    %c0_i32 = arith.constant 0 : i32
    %c0_i32_0 = arith.constant 0 : i32
    return %arg0, %c0_i32 : i32, i32
  }
  func.func @transform_1(%arg0: i32) -> (i32, i32) {
    %c0_i32 = arith.constant 0 : i32
    %c0_i32_0 = arith.constant 0 : i32
    %c0_i32_1 = arith.constant 0 : i32
    return %c0_i32, %c0_i32_0 : i32, i32
  }
  func.func @transform_2(%arg0: i32) -> (i32, i32) {
    %c0_i32 = arith.constant 0 : i32
    %c0_i32_0 = arith.constant 0 : i32
    %c0_i32_1 = arith.constant 0 : i32
    return %c0_i32, %c0_i32_0 : i32, i32
  }
  func.func @transform_3(%arg0: i32) -> (i32, i32) {
    %c0_i32 = arith.constant 0 : i32
    %c0_i32_0 = arith.constant 0 : i32
    %c0_i32_1 = arith.constant 0 : i32
    return %c0_i32, %c0_i32_0 : i32, i32
  }
  func.func @transform_4(%arg0: i32) -> (i32, i32) {
    %c0_i32 = arith.constant 0 : i32
    %c0_i32_0 = arith.constant 0 : i32
    %c0_i32_1 = arith.constant 0 : i32
    return %c0_i32, %c0_i32_0 : i32, i32
  }
  func.func @transform_5(%arg0: i32) -> (i32, i32) {
    %c0_i32 = arith.constant 0 : i32
    %c0_i32_0 = arith.constant 0 : i32
    return %arg0, %c0_i32 : i32, i32
  }
}

</mosaic_0001>

<bundles_post_ra>
// kernel: policy_network.1
= control target key start
LH: loop header
LB: loop body
LE: loop exit
PB: predicated region body
PF: predicated region fallthrough
CT: control target
= control target key end

     0   :  { %v253_v0 = vmov 0.0|0.0   ;;  %vm254_vm0 = vmmov 0   ;;  %v255_v3 = vmov 0.0   ;;  %vm30_vm1 = vcmask 130048   ;;  %s319_s1 = inlined_call_operand.vmem [shape: f32[16,32], index: 1, kind: input, shape index: {}]   ;;  %s320_s3 = inlined_call_operand.vmem [shape: f32[32,4], index: 3, kind: input, shape index: {}]   ;;  %s321_s0 = inlined_call_operand.vmem [shape: f32[8,16], index: 0, kind: input, shape index: {}]   ;;  %s322_s2 = inlined_call_operand.vmem [shape: f32[1,32], index: 2, kind: input, shape index: {}]   ;;  %s323_s4 = inlined_call_operand.vmem [shape: f32[1,4], index: 4, kind: input, shape index: {}]   ;;  %s324_s5 = inlined_call_operand.vmem [shape: f32[8,4], index: 5, kind: output, shape index: {}]  }
   0x1   :  { %237 = vmatprep.subr.bf16.mxu0 %v253_v0  ;;  %v21_v1 = vld [vmem:[%s319_s1] sm:$0xff]  ;;  %v22_v2 = vld [vmem:[%s319_s1 + $0x8] sm:$0xff]  ;;  %223 = vmatprep.mubr.msk.f32.mxu0 %vm254_vm0, %v255_v3  ;;  %v107_v9 = vld [vmem:[%s320_s3 + $0x10] sm:$0xff]  ;;  %vm116_vm2 = vcmask 261120   ;;  %vm190_vm3 = vcmask 31744  }
   0x2   :  { %v238_v4 = vpack.c.bf16 %v22_v2, %v21_v1  ;;  %240 = vmatprep.subr.bf16.mxu1 %v253_v0  ;;  %v105_v5 = vld [vmem:[%s320_s3] sm:$0xff]  ;;  %v106_v6 = vld [vmem:[%s320_s3 + $0x8] sm:$0xff]  ;;  %234 = vmatprep.mubr.msk.f32.mxu1 %vm254_vm0, %v255_v3  ;;  %v108_v10 = vld [vmem:[%s320_s3 + $0x18] sm:$0xff] }
   0x3   :  { %v241_v7 = vpack.c.bf16 %v106_v6, %v105_v5  ;;  %v20_v8 = vld [vmem:[%s321_s0] sm:$0xff]  ;;  %v244_v11 = vpack.c.bf16 %v108_v10, %v107_v9 }
   0x4   :  { %239 = vmatpush3.bf16.msra.mxu0 %v238_v4  ;;  %v207_v12 = vld [vmem:[%s322_s2] ss:$0 sm:$0xff] }
   0x5   :  { %242 = vmatpush3.bf16.msra.mxu1 %v241_v7  ;;  %v209_v17 = vld [vmem:[%s323_s4] ss:$0 sm:$0xff] }
   0x6   :  { %243 = vmatprep.subr.bf16.mxu1 %v253_v0 }
   0x7   :  { %224 = vmatmul.mubr.msk.f32.vlgmr.msra.gmra.mrb[0].mxu0 %vm30_vm1, %v20_v8 }
   0x9   :  { %245 = vmatpush3.bf16.msra.mxu1 %v244_v11 }
  0xda   :  { %v100_v13 = vpop.f32.mrb[0].mxu0 }
  0xdb   :  { %v101_v14 = vadd.f32 %v207_v12, %v100_v13  ;;  %v225_v15 = vpop.f32.mrb[1].mxu0 }
  0xdd   :  { %v104_v16 = vmax.f32 %v101_v14, 0.0 }
  0xdf   :  { %235 = vmatmul.mubr.msk.f32.vlgmr.msra.gmra.mrb[0].mxu1 %vm116_vm2, %v104_v16 }
 0x1b2   :  { %v186_v18 = vpop.f32.mrb[0].mxu1 }
 0x1b3   :  { %v187_v19 = vadd.f32 %v209_v17, %v186_v18  ;;  %v236_v20 = vpop.f32.mrb[1].mxu1 }
 0x1b5   :  { %v191_v21 = vsel %vm190_vm3, %v187_v19, -inf }
 0x1b6   :  { %192 = vmax.xlane.f32.xlu0 %v191_v21 }
 0x243   :  { %v193_v22 = vpop.xlane.xlu0 %192 }
 0x244   :  { %v194_v23 = vsub.f32 %v187_v19, %v193_v22 }
 0x246   :  { %v195_v24 = vmul.f32 1.442695, %v194_v23 }
 0x248   :  { %249 = vpow2.f32 %v195_v24 }
 0x252   :  { %v250_v25 = vpop.eup %249 }
 0x253   :  { %v197_v26 = vsel %vm190_vm3, %v250_v25, 0.0 }
 0x254   :  { %198 = vadd.xlane.f32.xlu0 %v197_v26 }
 0x2e1   :  { %v199_v27 = vpop.xlane.xlu0 %198 }
 0x2e2   :  { %251 = vrcp.f32 %v199_v27 }
 0x2ec   :  { %v252_v28 = vpop.eup %251 }
 0x2ed   :  { %v201_v29 = vmul.f32 %v252_v28, %v250_v25 }
 0x2ef   :  { %202 = vst.msk [vmem:[%s324_s5] sm:$0xff] %vm190_vm3, %v201_v29 }

</bundles_post_ra>
